<compile_context>
chip_gen: v7x
topology: tpu7x:2x2x1
jax: 0.10.0
libtpu: 0.0.40
codegen_flags: <defaults>
</compile_context>

<pallas_src>
import functools

import jax
import jax.numpy as jnp
from jax.experimental import pallas as pl
from jax.experimental.pallas import tpu as pltpu


# -----------------------------------------------------------------------------
# Pallas kernels
# -----------------------------------------------------------------------------
def _fill_im2col(col_ref, src, *, C, L, K, dilation, pad):
    """Write K dilated/shifted copies of src (C, L) into col_ref (K*C, L).

    Row block k of col_ref holds xpad[:, t + k*dilation] where xpad is src
    zero-padded by `pad` on each side, i.e. padding is handled here in VMEM
    (no HBM padded copy). All slice bounds are static Python ints.
    """
    col_ref[...] = jnp.zeros_like(col_ref)
    for k in range(K):
        s = k * dilation - pad          # shift into the un-padded signal
        r0 = k * C
        if s < 0:
            col_ref[r0:r0 + C, -s:L] = src[:, 0:L + s].astype(col_ref.dtype)
        elif s > 0:
            col_ref[r0:r0 + C, 0:L - s] = src[:, s:L].astype(col_ref.dtype)
        else:
            col_ref[r0:r0 + C, :] = src.astype(col_ref.dtype)


def _temporal_block_kernel(*refs, K, dilation, pad, L, c_in, c_mid,
                           has_downsample):
    """Fused TemporalBlock for one batch element.

    refs = (x, w1, b1, w2, b2[, w_ds, b_ds], out, xcol_scratch, hcol_scratch)
      x:     (1, c_in, L)
      w1:    (c_mid, K*c_in)   folded conv1 weight
      w2:    (c_mid, K*c_mid)  folded conv2 weight
      b*:    (c_mid, 1)        f32 biases
      w_ds:  (c_mid, c_in)     1x1 downsample weight (only if c_in != c_mid)
      out:   (1, c_mid, L)
    """
    if has_downsample:
        (x_ref, w1_ref, b1_ref, w2_ref, b2_ref, wd_ref, bd_ref,
         o_ref, xcol_ref, hcol_ref) = refs
    else:
        (x_ref, w1_ref, b1_ref, w2_ref, b2_ref,
         o_ref, xcol_ref, hcol_ref) = refs

    x = x_ref[0]                                          # (c_in, L)

    # conv1 + bias + ReLU  (single MXU matmul over K*c_in contraction)
    _fill_im2col(xcol_ref, x, C=c_in, L=L, K=K, dilation=dilation, pad=pad)
    h1 = jnp.dot(w1_ref[...], xcol_ref[...],
                 preferred_element_type=jnp.float32)
    h1 = jnp.maximum(h1 + b1_ref[...], 0.0)               # (c_mid, L) f32
    # dropout1: identity (eval semantics)

    # conv2 + bias + ReLU  (h1 never leaves VMEM)
    _fill_im2col(hcol_ref, h1, C=c_mid, L=L, K=K, dilation=dilation, pad=pad)
    h2 = jnp.dot(w2_ref[...], hcol_ref[...],
                 preferred_element_type=jnp.float32)
    h2 = jnp.maximum(h2 + b2_ref[...], 0.0)               # (c_mid, L) f32
    # dropout2: identity (eval semantics)

    # residual path (optional 1x1 downsample), fused add + ReLU epilogue
    if has_downsample:
        res = jnp.dot(wd_ref[...], x,
                      preferred_element_type=jnp.float32) + bd_ref[...]
    else:
        res = x.astype(jnp.float32)

    o_ref[0] = jnp.maximum(h2 + res, 0.0).astype(o_ref.dtype)


def _final_conv1x1_kernel(x_ref, w_ref, b_ref, o_ref):
    """1x1 Conv1d (final layer) for one batch element."""
    y = jnp.dot(w_ref[...], x_ref[0],
                preferred_element_type=jnp.float32) + b_ref[...]
    o_ref[0] = y.astype(o_ref.dtype)


# -----------------------------------------------------------------------------
# Wrappers around pallas_call
# -----------------------------------------------------------------------------
def temporal_block(x, params, *, kernel_size, dilation,
                   compute_dtype=jnp.float32):
    N, c_in, L = x.shape
    c_mid = params["w1"].shape[0]
    K = kernel_size
    pad = (K - 1) * dilation // 2
    # Same constraint as the PyTorch module: residual add requires L_out == L.
    assert (K - 1) * dilation % 2 == 0, "(K-1)*dilation must be even"
    assert pad < L, "receptive-field padding must be smaller than L"

    cdt = compute_dtype
    # Fold weights: (C_out, C_in, K) -> (C_out, K*C_in) matching im2col rows,
    # so per-tap extraction is gone and the conv is one MXU matmul.
    w1 = jnp.transpose(params["w1"], (0, 2, 1)).reshape(c_mid, K * c_in).astype(cdt)
    w2 = jnp.transpose(params["w2"], (0, 2, 1)).reshape(c_mid, K * c_mid).astype(cdt)
    b1 = params["b1"].reshape(c_mid, 1).astype(jnp.float32)
    b2 = params["b2"].reshape(c_mid, 1).astype(jnp.float32)
    has_ds = "w_ds" in params

    inputs = [x.astype(cdt), w1, b1, w2, b2]
    in_specs = [
        pl.BlockSpec((1, c_in, L), lambda n: (n, 0, 0)),
        pl.BlockSpec((c_mid, K * c_in), lambda n: (0, 0)),
        pl.BlockSpec((c_mid, 1), lambda n: (0, 0)),
        pl.BlockSpec((c_mid, K * c_mid), lambda n: (0, 0)),
        pl.BlockSpec((c_mid, 1), lambda n: (0, 0)),
    ]
    if has_ds:
        wd = params["w_ds"].reshape(c_mid, c_in).astype(cdt)
        bd = params["b_ds"].reshape(c_mid, 1).astype(jnp.float32)
        inputs += [wd, bd]
        in_specs += [
            pl.BlockSpec((c_mid, c_in), lambda n: (0, 0)),
            pl.BlockSpec((c_mid, 1), lambda n: (0, 0)),
        ]

    kern = functools.partial(
        _temporal_block_kernel, K=K, dilation=dilation, pad=pad, L=L,
        c_in=c_in, c_mid=c_mid, has_downsample=has_ds)

    return pl.pallas_call(
        kern,
        out_shape=jax.ShapeDtypeStruct((N, c_mid, L), cdt),
        grid=(N,),
        in_specs=in_specs,
        out_specs=pl.BlockSpec((1, c_mid, L), lambda n: (n, 0, 0)),
        scratch_shapes=[
            pltpu.VMEM((K * c_in, L), cdt),    # im2col of x
            pltpu.VMEM((K * c_mid, L), cdt),   # im2col of h1
        ],
        compiler_params=pltpu.CompilerParams(
            dimension_semantics=("parallel",),        # batch across TCs (v7x)
            vmem_limit_bytes=32 * 1024 * 1024,        # safe on v5e/v6e/v7x
        ),
    )(*inputs)


def final_conv1x1(x, w, b, *, compute_dtype=jnp.float32):
    N, c_in, L = x.shape
    c_out = w.shape[0]
    w2 = w.reshape(c_out, c_in).astype(compute_dtype)
    b2 = b.reshape(c_out, 1).astype(jnp.float32)
    return pl.pallas_call(
        _final_conv1x1_kernel,
        out_shape=jax.ShapeDtypeStruct((N, c_out, L), jnp.float32),
        grid=(N,),
        in_specs=[
            pl.BlockSpec((1, c_in, L), lambda n: (n, 0, 0)),
            pl.BlockSpec((c_out, c_in), lambda n: (0, 0)),
            pl.BlockSpec((c_out, 1), lambda n: (0, 0)),
        ],
        out_specs=pl.BlockSpec((1, c_out, L), lambda n: (n, 0, 0)),
        compiler_params=pltpu.CompilerParams(
            dimension_semantics=("parallel",)),
    )(x.astype(compute_dtype), w2, b2)


# -----------------------------------------------------------------------------
# Parameter init (deterministic, PyTorch-Conv1d-style uniform bounds)
# -----------------------------------------------------------------------------
def _uniform(key, shape, fan_in):
    bound = 1.0 / (fan_in ** 0.5)
    return jax.random.uniform(key, shape, jnp.float32, -bound, bound)


def init_tcn_params(key, num_inputs, num_channels, kernel_size=3):
    blocks = []
    for i, c_out in enumerate(num_channels):
        c_in = num_inputs if i == 0 else num_channels[i - 1]
        key, k1, k2, k3, k4, k5, k6 = jax.random.split(key, 7)
        block = {
            "w1": _uniform(k1, (c_out, c_in, kernel_size), c_in * kernel_size),
            "b1": _uniform(k2, (c_out,), c_in * kernel_size),
            "w2": _uniform(k3, (c_out, c_out, kernel_size), c_out * kernel_size),
            "b2": _uniform(k4, (c_out,), c_out * kernel_size),
        }
        if c_in != c_out:
            block["w_ds"] = _uniform(k5, (c_out, c_in, 1), c_in)
            block["b_ds"] = _uniform(k6, (c_out,), c_in)
        blocks.append(block)
    key, kf1, kf2 = jax.random.split(key, 3)
    c_last = num_channels[-1]
    final = {
        "w": _uniform(kf1, (1, c_last, 1), c_last),
        "b": _uniform(kf2, (1,), c_last),
    }
    return blocks, final


# -----------------------------------------------------------------------------
# TemporalConvNet forward (one fused pallas_call per residual block)
# -----------------------------------------------------------------------------
def tcn_forward(x, blocks, final, kernel_size=3, compute_dtype=jnp.float32):
    out = x
    for i, p in enumerate(blocks):
        out = temporal_block(out, p, kernel_size=kernel_size,
                             dilation=2 ** i, compute_dtype=compute_dtype)
    return final_conv1x1(out, final["w"], final["b"],
                         compute_dtype=compute_dtype)


# -----------------------------------------------------------------------------
# Pure-JAX reference (for correctness check only)
# -----------------------------------------------------------------------------
def _conv1d_ref(x, w, b, dilation=1, padding=0):
    N, C_in, L = x.shape
    C_out, _, K = w.shape
    xp = jnp.pad(x, ((0, 0), (0, 0), (padding, padding)))
    L_out = L + 2 * padding - dilation * (K - 1)
    out = jnp.zeros((N, C_out, L_out), jnp.float32)
    for k in range(K):
        out = out + jnp.einsum(
            "oc,ncl->nol", w[:, :, k], xp[:, :, k * dilation:k * dilation + L_out]
        )
    return out + b[None, :, None]


def tcn_forward_ref(x, blocks, final, kernel_size=3):
    out = x
    for i, p in enumerate(blocks):
        d = 2 ** i
        pad = (kernel_size - 1) * d // 2
        h = jnp.maximum(_conv1d_ref(out, p["w1"], p["b1"], d, pad), 0.0)
        h = jnp.maximum(_conv1d_ref(h, p["w2"], p["b2"], d, pad), 0.0)
        res = _conv1d_ref(out, p["w_ds"], p["b_ds"]) if "w_ds" in p else out
        out = jnp.maximum(h + res, 0.0)
    return _conv1d_ref(out, final["w"], final["b"])


# -----------------------------------------------------------------------------
if __name__ == "__main__":
    key = jax.random.PRNGKey(0)
    k_x, k_p = jax.random.split(key)

    N, C_in, L = 2, 4, 16
    num_channels = (8, 8)
    kernel_size = 3

    x = jax.random.normal(k_x, (N, C_in, L), jnp.float32)
    blocks, final = init_tcn_params(k_p, C_in, num_channels, kernel_size)

    ref = tcn_forward_ref(x, blocks, final, kernel_size)

    # f32 path: tight correctness check
    out = jax.block_until_ready(tcn_forward(x, blocks, final, kernel_size))
    assert out.shape == (N, 1, L), out.shape
    assert jnp.allclose(out, ref, atol=1e-3, rtol=1e-3), "f32 mismatch vs ref"

    # bf16 fast path (MXU-native rate, half the HBM/VMEM traffic), loose check
    out_bf16 = jax.block_until_ready(
        tcn_forward(x, blocks, final, kernel_size, compute_dtype=jnp.bfloat16))
    assert out_bf16.shape == (N, 1, L), out_bf16.shape
    assert jnp.allclose(out_bf16, ref, atol=1e-1, rtol=1e-1), "bf16 mismatch vs ref"

    print("KERNEL_OK")
</pallas_src>

<mosaic_0001>
module attributes {stable_mosaic.version = 11 : i64} {
  func.func @_temporal_block_kernel(%arg0: i32, %arg1: memref<1x4x16xf32, #tpu.memory_space<vmem>>, %arg2: memref<8x12xf32, #tpu.memory_space<vmem>>, %arg3: memref<8x1xf32, #tpu.memory_space<vmem>>, %arg4: memref<8x24xf32, #tpu.memory_space<vmem>>, %arg5: memref<8x1xf32, #tpu.memory_space<vmem>>, %arg6: memref<8x4xf32, #tpu.memory_space<vmem>>, %arg7: memref<8x1xf32, #tpu.memory_space<vmem>>, %arg8: memref<1x8x16xf32, #tpu.memory_space<vmem>>, %arg9: memref<12x16xf32, #tpu.memory_space<vmem>>, %arg10: memref<24x16xf32, #tpu.memory_space<vmem>>) attributes {dimension_semantics = [#tpu.dimension_semantics<parallel>], iteration_bounds = array<i64: 2>, scalar_prefetch = 0 : i64, scratch_operands = 2 : i64, tpu.core_type = #tpu.core_type<tc>, window_params = [{transform_indices = @transform_0, window_bounds = array<i64: 1, 4, 16>}, {pipeline_mode = #tpu.pipeline_mode<synchronous>, transform_indices = @transform_1, window_bounds = array<i64: 8, 12>}, {pipeline_mode = #tpu.pipeline_mode<synchronous>, transform_indices = @transform_2, window_bounds = array<i64: 8, 1>}, {pipeline_mode = #tpu.pipeline_mode<synchronous>, transform_indices = @transform_3, window_bounds = array<i64: 8, 24>}, {pipeline_mode = #tpu.pipeline_mode<synchronous>, transform_indices = @transform_4, window_bounds = array<i64: 8, 1>}, {pipeline_mode = #tpu.pipeline_mode<synchronous>, transform_indices = @transform_5, window_bounds = array<i64: 8, 4>}, {pipeline_mode = #tpu.pipeline_mode<synchronous>, transform_indices = @transform_6, window_bounds = array<i64: 8, 1>}, {transform_indices = @transform_7, window_bounds = array<i64: 1, 8, 16>}]} {
    %c0 = arith.constant 0 : index
    %c0_0 = arith.constant 0 : index
    %c0_1 = arith.constant 0 : index
    %0 = vector.load %arg1[%c0, %c0_0, %c0_1] : memref<1x4x16xf32, #tpu.memory_space<vmem>>, vector<1x4x16xf32>
    %1 = vector.shape_cast %0 : vector<1x4x16xf32> to vector<4x16xf32>
    %cst = arith.constant 0.000000e+00 : f32
    %2 = vector.broadcast %cst : f32 to vector<12x16xf32>
    %c0_2 = arith.constant 0 : index
    %c0_3 = arith.constant 0 : index
    %3 = vector.load %arg9[%c0_2, %c0_3] : memref<12x16xf32, #tpu.memory_space<vmem>>, vector<12x16xf32>
    tpu.vector_store %arg9[%c0_2, %c0_3], %2 {strides = array<i32>} : memref<12x16xf32, #tpu.memory_space<vmem>>, vector<12x16xf32>,
    %4 = vector.extract_strided_slice %1 {offsets = [0, 0], sizes = [4, 15], strides = [1, 1]} : vector<4x16xf32> to vector<4x15xf32>
    %c0_4 = arith.constant 0 : index
    %c1 = arith.constant 1 : index
    %5 = vector.load %arg9[%c0_4, %c1] : memref<12x16xf32, #tpu.memory_space<vmem>>, vector<4x15xf32>
    tpu.vector_store %arg9[%c0_4, %c1], %4 {strides = array<i32>} : memref<12x16xf32, #tpu.memory_space<vmem>>, vector<4x15xf32>,
    %c4 = arith.constant 4 : index
    %c0_5 = arith.constant 0 : index
    %6 = vector.load %arg9[%c4, %c0_5] : memref<12x16xf32, #tpu.memory_space<vmem>>, vector<4x16xf32>
    tpu.vector_store %arg9[%c4, %c0_5], %1 {strides = array<i32>} : memref<12x16xf32, #tpu.memory_space<vmem>>, vector<4x16xf32>,
    %7 = vector.extract_strided_slice %1 {offsets = [0, 1], sizes = [4, 15], strides = [1, 1]} : vector<4x16xf32> to vector<4x15xf32>
    %c8 = arith.constant 8 : index
    %c0_6 = arith.constant 0 : index
    %8 = vector.load %arg9[%c8, %c0_6] : memref<12x16xf32, #tpu.memory_space<vmem>>, vector<4x15xf32>
    tpu.vector_store %arg9[%c8, %c0_6], %7 {strides = array<i32>} : memref<12x16xf32, #tpu.memory_space<vmem>>, vector<4x15xf32>,
    %c0_7 = arith.constant 0 : index
    %c0_8 = arith.constant 0 : index
    %9 = vector.load %arg2[%c0_7, %c0_8] : memref<8x12xf32, #tpu.memory_space<vmem>>, vector<8x12xf32>
    %c0_9 = arith.constant 0 : index
    %c0_10 = arith.constant 0 : index
    %10 = vector.load %arg9[%c0_9, %c0_10] : memref<12x16xf32, #tpu.memory_space<vmem>>, vector<12x16xf32>
    %cst_11 = arith.constant dense<0.000000e+00> : vector<8x16xf32>
    %11 = tpu.matmul %9, %10, %cst_11 {dimension_numbers = #tpu.dot_dimension_numbers<[1], [0], [0], [1], [0, 0, 1, 1], [], []>} : vector<8x12xf32>, vector<12x16xf32>, vector<8x16xf32> -> vector<8x16xf32>
    %c0_12 = arith.constant 0 : index
    %c0_13 = arith.constant 0 : index
    %12 = vector.load %arg3[%c0_12, %c0_13] : memref<8x1xf32, #tpu.memory_space<vmem>>, vector<8x1xf32>
    %13 = vector.broadcast %12 : vector<8x1xf32> to vector<8x16xf32>
    %14 = arith.addf %11, %13 : vector<8x16xf32>
    %cst_14 = arith.constant 0.000000e+00 : f32
    %15 = vector.broadcast %cst_14 : f32 to vector<8x16xf32>
    %16 = arith.maximumf %14, %15 : vector<8x16xf32>
    %cst_15 = arith.constant 0.000000e+00 : f32
    %17 = vector.broadcast %cst_15 : f32 to vector<24x16xf32>
    %c0_16 = arith.constant 0 : index
    %c0_17 = arith.constant 0 : index
    %18 = vector.load %arg10[%c0_16, %c0_17] : memref<24x16xf32, #tpu.memory_space<vmem>>, vector<24x16xf32>
    tpu.vector_store %arg10[%c0_16, %c0_17], %17 {strides = array<i32>} : memref<24x16xf32, #tpu.memory_space<vmem>>, vector<24x16xf32>,
    %19 = vector.extract_strided_slice %16 {offsets = [0, 0], sizes = [8, 15], strides = [1, 1]} : vector<8x16xf32> to vector<8x15xf32>
    %c0_18 = arith.constant 0 : index
    %c1_19 = arith.constant 1 : index
    %20 = vector.load %arg10[%c0_18, %c1_19] : memref<24x16xf32, #tpu.memory_space<vmem>>, vector<8x15xf32>
    tpu.vector_store %arg10[%c0_18, %c1_19], %19 {strides = array<i32>} : memref<24x16xf32, #tpu.memory_space<vmem>>, vector<8x15xf32>,
    %c8_20 = arith.constant 8 : index
    %c0_21 = arith.constant 0 : index
    %21 = vector.load %arg10[%c8_20, %c0_21] : memref<24x16xf32, #tpu.memory_space<vmem>>, vector<8x16xf32>
    tpu.vector_store %arg10[%c8_20, %c0_21], %16 {strides = array<i32>} : memref<24x16xf32, #tpu.memory_space<vmem>>, vector<8x16xf32>,
    %22 = vector.extract_strided_slice %16 {offsets = [0, 1], sizes = [8, 15], strides = [1, 1]} : vector<8x16xf32> to vector<8x15xf32>
    %c16 = arith.constant 16 : index
    %c0_22 = arith.constant 0 : index
    %23 = vector.load %arg10[%c16, %c0_22] : memref<24x16xf32, #tpu.memory_space<vmem>>, vector<8x15xf32>
    tpu.vector_store %arg10[%c16, %c0_22], %22 {strides = array<i32>} : memref<24x16xf32, #tpu.memory_space<vmem>>, vector<8x15xf32>,
    %c0_23 = arith.constant 0 : index
    %c0_24 = arith.constant 0 : index
    %24 = vector.load %arg4[%c0_23, %c0_24] : memref<8x24xf32, #tpu.memory_space<vmem>>, vector<8x24xf32>
    %c0_25 = arith.constant 0 : index
    %c0_26 = arith.constant 0 : index
    %25 = vector.load %arg10[%c0_25, %c0_26] : memref<24x16xf32, #tpu.memory_space<vmem>>, vector<24x16xf32>
    %cst_27 = arith.constant dense<0.000000e+00> : vector<8x16xf32>
    %26 = tpu.matmul %24, %25, %cst_27 {dimension_numbers = #tpu.dot_dimension_numbers<[1], [0], [0], [1], [0, 0, 1, 1], [], []>} : vector<8x24xf32>, vector<24x16xf32>, vector<8x16xf32> -> vector<8x16xf32>
    %c0_28 = arith.constant 0 : index
    %c0_29 = arith.constant 0 : index
    %27 = vector.load %arg5[%c0_28, %c0_29] : memref<8x1xf32, #tpu.memory_space<vmem>>, vector<8x1xf32>
    %28 = vector.broadcast %27 : vector<8x1xf32> to vector<8x16xf32>
    %29 = arith.addf %26, %28 : vector<8x16xf32>
    %cst_30 = arith.constant 0.000000e+00 : f32
    %30 = vector.broadcast %cst_30 : f32 to vector<8x16xf32>
    %31 = arith.maximumf %29, %30 : vector<8x16xf32>
    %c0_31 = arith.constant 0 : index
    %c0_32 = arith.constant 0 : index
    %32 = vector.load %arg6[%c0_31, %c0_32] : memref<8x4xf32, #tpu.memory_space<vmem>>, vector<8x4xf32>
    %cst_33 = arith.constant dense<0.000000e+00> : vector<8x16xf32>
    %33 = tpu.matmul %32, %1, %cst_33 {dimension_numbers = #tpu.dot_dimension_numbers<[1], [0], [0], [1], [0, 0, 1, 1], [], []>} : vector<8x4xf32>, vector<4x16xf32>, vector<8x16xf32> -> vector<8x16xf32>
    %c0_34 = arith.constant 0 : index
    %c0_35 = arith.constant 0 : index
    %34 = vector.load %arg7[%c0_34, %c0_35] : memref<8x1xf32, #tpu.memory_space<vmem>>, vector<8x1xf32>
    %35 = vector.broadcast %34 : vector<8x1xf32> to vector<8x16xf32>
    %36 = arith.addf %33, %35 : vector<8x16xf32>
    %37 = arith.addf %31, %36 : vector<8x16xf32>
    %cst_36 = arith.constant 0.000000e+00 : f32
    %38 = vector.broadcast %cst_36 : f32 to vector<8x16xf32>
    %39 = arith.maximumf %37, %38 : vector<8x16xf32>
    %c0_37 = arith.constant 0 : index
    %c0_38 = arith.constant 0 : index
    %c0_39 = arith.constant 0 : index
    %40 = vector.load %arg8[%c0_37, %c0_38, %c0_39] : memref<1x8x16xf32, #tpu.memory_space<vmem>>, vector<1x8x16xf32>
    %41 = vector.shape_cast %40 : vector<1x8x16xf32> to vector<8x16xf32>
    %42 = vector.shape_cast %39 : vector<8x16xf32> to vector<1x8x16xf32>
    tpu.vector_store %arg8[%c0_37, %c0_38, %c0_39], %42 {strides = array<i32>} : memref<1x8x16xf32, #tpu.memory_space<vmem>>, vector<1x8x16xf32>,
    return
  }
  func.func @transform_0(%arg0: i32) -> (i32, i32, i32) {
    %c0_i32 = arith.constant 0 : i32
    %c0_i32_0 = arith.constant 0 : i32
    %c0_i32_1 = arith.constant 0 : i32
    return %arg0, %c0_i32, %c0_i32_0 : i32, i32, i32
  }
  func.func @transform_1(%arg0: i32) -> (i32, i32) {
    %c0_i32 = arith.constant 0 : i32
    %c0_i32_0 = arith.constant 0 : i32
    %c0_i32_1 = arith.constant 0 : i32
    return %c0_i32, %c0_i32_0 : i32, i32
  }
  func.func @transform_2(%arg0: i32) -> (i32, i32) {
    %c0_i32 = arith.constant 0 : i32
    %c0_i32_0 = arith.constant 0 : i32
    %c0_i32_1 = arith.constant 0 : i32
    return %c0_i32, %c0_i32_0 : i32, i32
  }
  func.func @transform_3(%arg0: i32) -> (i32, i32) {
    %c0_i32 = arith.constant 0 : i32
    %c0_i32_0 = arith.constant 0 : i32
    %c0_i32_1 = arith.constant 0 : i32
    return %c0_i32, %c0_i32_0 : i32, i32
  }
  func.func @transform_4(%arg0: i32) -> (i32, i32) {
    %c0_i32 = arith.constant 0 : i32
    %c0_i32_0 = arith.constant 0 : i32
    %c0_i32_1 = arith.constant 0 : i32
    return %c0_i32, %c0_i32_0 : i32, i32
  }
  func.func @transform_5(%arg0: i32) -> (i32, i32) {
    %c0_i32 = arith.constant 0 : i32
    %c0_i32_0 = arith.constant 0 : i32
    %c0_i32_1 = arith.constant 0 : i32
    return %c0_i32, %c0_i32_0 : i32, i32
  }
  func.func @transform_6(%arg0: i32) -> (i32, i32) {
    %c0_i32 = arith.constant 0 : i32
    %c0_i32_0 = arith.constant 0 : i32
    %c0_i32_1 = arith.constant 0 : i32
    return %c0_i32, %c0_i32_0 : i32, i32
  }
  func.func @transform_7(%arg0: i32) -> (i32, i32, i32) {
    %c0_i32 = arith.constant 0 : i32
    %c0_i32_0 = arith.constant 0 : i32
    %c0_i32_1 = arith.constant 0 : i32
    return %arg0, %c0_i32, %c0_i32_0 : i32, i32, i32
  }
}

</mosaic_0001>

<bundles_post_ra>
// kernel: tpu_custom_call.1
= control target key start
LH: loop header
LB: loop body
LE: loop exit
PB: predicated region body
PF: predicated region fallthrough
CT: control target
= control target key end

     0   :  { %12 = vsyncpa [#allocation5], 0  ;;  %s993_s0 = inlined_call_operand.vmem [shape: f32[2,4,16], index: 0, kind: input, shape index: {}]   ;;  %s994_s1 = inlined_call_operand.vmem [shape: f32[8,12], index: 1, kind: input, shape index: {}]   ;;  %s995_s2 = inlined_call_operand.vmem [shape: f32[8,1], index: 2, kind: input, shape index: {}]   ;;  %s996_s3 = inlined_call_operand.vmem [shape: f32[8,24], index: 3, kind: input, shape index: {}]   ;;  %s997_s4 = inlined_call_operand.vmem [shape: f32[8,1], index: 4, kind: input, shape index: {}]   ;;  %s998_s5 = inlined_call_operand.vmem [shape: f32[8,4], index: 5, kind: input, shape index: {}]   ;;  %s999_s6 = inlined_call_operand.vmem [shape: f32[8,1], index: 6, kind: input, shape index: {}]   ;;  %s1000_s7 = inlined_call_operand.hbm [shape: f32[2,8,16], index: 7, kind: output, shape index: {}]  }
   0x1   :  { %14 = vsyncpa [#allocation5 + $0x1], 0  ;;  %s850_s24 = smov 0   ;;  %s852_s25 = smov 0  }
   0x2   :  { %s854_s26 = smov 0   ;;  %s856_s27 = smov 0  }
   0x3 LB: > { %s871_s28 = sadd.s32 4294967295, %s800_s27   ;;  %s638_s29 = sadd.s32 4294967294, %s800_s27   ;;  %s800_s27 = sphi %s856_s27, %s1006_s27   ;;  %s796_s26 = sphi %s854_s26, %s1005_s26   ;;  %s792_s25 = sphi %s852_s25, %s1004_s25   ;;  %s788_s24 = sphi %s850_s24, %s1003_s24  }
   0x4   : > { %s875_s30 = sadd.s32 1, %s800_s27   ;;  %s179_s8 = sadd.s32 1, %s796_s26 }
   0x5   : > { %s176_s9 = ssub.s32 %s800_s27, %s875_s30  ;;  %p189_p0 = scmp.ne.s32.totalorder %s796_s26, %s792_s25 }
   0x6   : > { %p177_p1 = scmp.eq.s32.totalorder %s176_s9, 0  ;;  %p190_p2 = scmp.eq.s32.totalorder %s871_s28, 1 }
   0x7   : > { %p195_p3 = scmp.ne.s32.totalorder %s792_s25, %s788_s24  ;;  %p196_p4 = scmp.eq.s32.totalorder %s638_s29, 1 }
   0x8   : > { %s886_s10 = scalar_select %p177_p1, %s796_s26, %s179_s8  }
   0x9   : > { %p888_p5 = por %p190_p2, %p189_p0  ;;  %p892_p6 = por %p196_p4, %p195_p3 }
   0xa   : > { %p641_p7 = scmp.ge.s32.totalorder %s800_s27, 1  ;;  %p239_p8 = scmp.lt.s32.totalorder %s800_s27, 3 }
   0xc   : > { %p240_p9 = pnand %p641_p7, %p239_p8 }
   0xd   : > { %p270_p10 = scmp.lt.s32.totalorder (!%p240_p9), %s871_s28, 1  ;;  %vm275_vm0 = vcmask (!%p240_p9), 130048   ;;  %vm277_vm1 = vcmask (!%p240_p9), 125952   ;;  %v802_v0 = vmov (!%p240_p9), 0.0   ;;  %v803_v1 = vmov (!%p240_p9), 0.0|0.0   ;;  %s804_s18 = smov (!%p240_p9), 1  }
   0xe   : > { %243 = sbr.rel (%p240_p9) target bundleno = 739 (0x2e3), region = 48  ;;  %276 = vst.msk [vmem:[#allocation2] sm:$0xff] (!%p240_p9), %vm275_vm0, %v802_v0  ;;  %379 = vst.msk [vmem:[#allocation3] sm:$0xff] (!%p240_p9), %vm275_vm0, %v802_v0  ;;  %683 = vmatprep.subr.bf16.mxu0 (!%p240_p9), %v803_v1  ;;  %687 = vmatprep.subr.bf16.mxu1 (!%p240_p9), %v803_v1  ;;  %vm805_vm2 = vmmov (!%p240_p9), 0   ;;  %s806_s19 = smov (!%p240_p9), 127   ;;  %v294_v3 = vld [vmem:[%s995_s2] sm:$0xff] (!%p240_p9) }
   0xf   : > { %380 = vst.msk [vmem:[#allocation3 + $0x8] sm:$0xff] (!%p240_p9), %vm275_vm0, %v802_v0  ;;  %381 = vst.msk [vmem:[#allocation3 + $0x10] sm:$0xff] (!%p240_p9), %vm275_vm0, %v802_v0  ;;  %666 = vmatprep.mubr.msk.f32.mxu0 (!%p240_p9), %vm805_vm2, %v802_v0  ;;  %675 = vmatprep.mubr.msk.f32.mxu1 (!%p240_p9), %vm805_vm2, %v802_v0  ;;  %v807_v4 = vmov (!%p240_p9), 0   ;;  %vm283_vm3 = vcmask (!%p240_p9), 125960   ;;  %vm289_vm4 = vcmask (!%p240_p9), 117760   ;;  %vm304_vm5 = vcmask (!%p240_p9), 1043456  }
  0x10   : > { %278 = vst.msk [vmem:[#allocation2 + $0x8] sm:$0xf] (!%p240_p9), %vm277_vm1, %v802_v0  ;;  %736 = vset.pattern.permute.xlu1 (!%p240_p9), %v807_v4  ;;  %737 = vset.pattern.permute.xlu0 (!%p240_p9), %v807_v4  ;;  %vm808_vm6 = vmmov (!%p240_p9), 1   ;;  %v291_v10 = vld [vmem:[%s994_s1] sm:$0xff] (!%p240_p9)  ;;  %vm300_vm8 = vcmask (!%p240_p9), 97280   ;;  %vm486_vm9 = vcmask (!%p240_p9), 31744  }
  0x11   : > { %297 = vperm.xlu1 (!%p240_p9), %736, %v294_v3   ;;  %vm685_vm7 = vmpackc.low (!%p240_p9), %vm304_vm5, %vm808_vm6  ;;  %v398_v16 = vld [vmem:[%s997_s4] sm:$0xff] (!%p240_p9)  ;;  %vm392_vm10 = vcmask (!%p240_p9), 121856   ;;  %vm386_vm11 = vcmask (!%p240_p9), 130056   ;;  %vm404_vm12 = vcmask (!%p240_p9), 195584   ;;  %s650_s20 = sshll.u32 (!%p240_p9), %s871_s28, 7 }
  0x12   : > { %v479_v17 = vld [vmem:[%s998_s5] sm:$0xff] (!%p240_p9)  ;;  %s950_s8 = scalar_lea.hbm (!%p240_p9), %s1000_s7, %s650_s20 }
  0x13   : > { %v480_v18 = vld [vmem:[%s999_s6] sm:$0xff] (!%p240_p9) }
  0x14   : > { %v394_v24 = vld [vmem:[%s996_s3] sm:$0xff] (!%p240_p9) }
  0x15   : > { %s271_s13 = scalar_select %p270_p10, %s871_s28, 1 }
  0x16   : > { %s809_s28 = smov [#allocation4]  }
  0x17   : > { %s643_s14 = sshll.u32 %s271_s13, 2 }
  0x18   : > { %s273_s17 = scalar_lea.vmem %s993_s0, %s643_s14  ;;  %s742_s14 = sshll.u32 %s809_s28, 4  ;;  %s743_s14 = int_to_ptr.vmem [resolvable:$false] %s742_s14 }
  0x19   : > { %v274_v2 = vld [vmem:[%s273_s17] sm:$0xf]  ;;  %s744_s15 = scalar_lea.vmem %s743_s14, 256 }
  0x1a   : > { %280 = vrot.lane.b32.xlu0 %v274_v2, %s804_s18  ;;  %285 = vst.msk [vmem:[#allocation2 + $0x4] sm:$0xf] %vm277_vm1, %v274_v2 }
  0x1e   : > { %286 = vrot.lane.b32.xlu0 %v274_v2, %s806_s19 }
  0x8c   : > { %v281_v5 = vpop.permute.xlu0 %280 }
  0x8d   : > { %284 = vst.msk [vmem:[#allocation2] sm:$0xf] %vm283_vm3, %v281_v5 }
  0x90   : > { %v287_v6 = vpop.permute.xlu0 %286  ;;  %v298_v11 = vpop.permute.xlu1 %297 }
  0x91   : > { %290 = vst.msk [vmem:[#allocation2 + $0x8] sm:$0xf] %vm289_vm4, %v287_v6 }
  0x94   : > { %v292_v7 = vld [vmem:[#allocation2] sm:$0xff] }
  0x98   : > { %v293_v8 = vld [vmem:[#allocation2 + $0x8] sm:$0xf] }
  0x99   : > { %v684_v9 = vpack.c.bf16 %v293_v8, %v292_v7 }
  0x9b   : > { %686 = vmatpush3.bf16.msk.msra.mxu0 %vm685_vm7, %v684_v9 }
  0x9c   : > { %678 = vmatprep.subr.mxu0 %v802_v0 }
  0x9e   : > { %667 = vmatmul.mubr.msk.f32.vlgmr.msra.gmra.mrb[0].mxu0 %vm300_vm8, %v291_v10 }
  0x9f   : > { %679 = vmatpush3.msk.msra.mxu0 %vm304_vm5, %v274_v2  ;;  %680 = vmatprep.mubr.msk.f32.mxu0 %vm805_vm2, %v802_v0 }
  0xa2   : > { %681 = vmatmul.mubr.msk.f32.vlgmr.msra.gmra.mrb[2].mxu0 %vm486_vm9, %v479_v17 }
 0x171   : > { %v374_v12 = vpop.f32.mrb[0].mxu0 }
 0x172   : > { %v375_v13 = vadd.f32 %v374_v12, %v298_v11  ;;  %v668_v14 = vpop.f32.mrb[1].mxu0 }
 0x174   : > { %v378_v15 = vmax.f32 %v375_v13, 0.0 }
 0x175   : > { %v558_v26 = vpop.f32.mrb[2].mxu0 }
 0x176   : > { %388 = vst.msk [vmem:[#allocation3 + $0x8] sm:$0xff] %vm275_vm0, %v378_v15  ;;  %389 = vrot.lane.b32.xlu0 %v378_v15, %s806_s19  ;;  %383 = vrot.lane.b32.xlu1 %v378_v15, %s804_s18  ;;  %v682_v27 = vpop.f32.mrb[3].mxu0  ;;  %s267_s18 = sand.u32 1, %s792_s25  }
 0x177   : > { %s642_s19 = sshll.u32 %s267_s18, 3  ;;  %s566_s9 = scalar_lea.sflag [#allocation5], %s267_s18 }
 0x178   : > { %s269_s21 = scalar_lea.vmem [#allocation4], %s642_s19 }
 0x179   : > { %s579_s22 = sshll.u32 %s269_s21, 4  ;;  %s952_s22 = int_to_ptr.vmem [resolvable:$true] %s579_s22 }
 0x17a   : > { %401 = vperm.xlu1 %736, %v398_v16   ;;  %483 = vperm.xlu0 %737, %v480_v18   ;;  %s738_s13 = scalar_lea.vmem %s952_s22, 128  ;;  %p745_p0 = scmp.lt.s32.totalorder %s952_s22, %s743_s14 }
 0x17b   : > { %p739_p11 = scmp.ne.s32.totalorder %s952_s22, %s738_s13  ;;  %p746_p1 = scmp.lt.s32.totalorder %s744_s15, %s738_s13 }
 0x17d   : > { %v396_v22 = vld [vmem:[#allocation3 + $0x8] sm:$0xff]  ;;  %p740_p12 = pnand %p739_p11, %p888_p5  ;;  %p747_p2 = por %p746_p1, %p745_p0 }
 0x17f   : > { %p741_p13 = pneg %p740_p12 }
 0x181   : > { %p748_p3 = pnand %p747_p2, %p741_p13 }
 0x1e8   : > { %v390_v19 = vpop.permute.xlu0 %389  ;;  %v384_v20 = vpop.permute.xlu1 %383 }
 0x1e9   : > { %393 = vst.msk [vmem:[#allocation3 + $0x10] sm:$0xff] %vm392_vm10, %v390_v19 }
 0x1ea   : > { %387 = vst.msk [vmem:[#allocation3] sm:$0xff] %vm386_vm11, %v384_v20 }
 0x1f0   : > { %v397_v25 = vld [vmem:[#allocation3 + $0x10] sm:$0xff] }
 0x1f1   : > { %v395_v21 = vld [vmem:[#allocation3] sm:$0xff] }
 0x1f2   : > { %v688_v23 = vpack.c.bf16 %v396_v22, %v395_v21 }
 0x1f4   : > { %689 = vmatpush3.bf16.msra.mxu1 %v688_v23 }
 0x1f5   : > { %673 = vmatprep.subr.mxu1 %v802_v0 }
 0x1f8   : > { %674 = vmatpush3.msra.mxu1 %v397_v25 }
 0x1f9   : > { %676 = vmatmul.mubr.msk.f32.vlgmr.msra.gmra.mrb[0].mxu1 %vm404_vm12, %v394_v24  ;;  %v484_v28 = vpop.permute.xlu0 %483  ;;  %v402_v29 = vpop.permute.xlu1 %401 }
 0x1fa   : > { %v559_v33 = vadd.f32 %v558_v26, %v484_v28 }
 0x2cc   : > { %v474_v30 = vpop.f32.mrb[0].mxu1 }
 0x2cd   : > { %v475_v31 = vadd.f32 %v474_v30, %v402_v29  ;;  %v677_v32 = vpop.f32.mrb[1].mxu1 }
 0x2cf   : > { %v478_v34 = vmax.f32 %v475_v31, 0.0 }
 0x2d1   : > { %v562_v35 = vadd.f32 %v559_v33, %v478_v34 }
 0x2d3   : > { %v563_v36 = vmax.f32 %v562_v35, 0.0 }
 0x2d5   : > { %564 = vst.msk [vmem:[%s269_s21] sm:$0xff] %vm275_vm0, %v563_v36 }
 0x2d6   : > { %751 = shalt.err (!%p748_p3)
}
 0x2d7   : > { %s752_s16 = scalar_lea.hbm %s950_s8, 128  ;;  %s756_s19 = scalar_lea.hbm %s1000_s7, 256 }
 0x2d8   : > { %p753_p4 = scmp.ne.s32.totalorder %s950_s8, %s752_s16  ;;  %p757_p9 = scmp.lt.u32.totalorder %s950_s8, %s1000_s7 }
 0x2d9   : > { %p758_p10 = scmp.lt.u32.totalorder %s756_s19, %s752_s16  ;;  %p760_p12 = scmp.lt.u32.totalorder %s752_s16, %s950_s8 }
 0x2da   : > { %p754_p7 = pnand %p753_p4, %p888_p5 }
 0x2db   : > { %p759_p11 = por %p758_p10, %p757_p9 }
 0x2dc   : > { %p755_p8 = pneg %p754_p7 }
 0x2dd   : > { %p761_p13 = por %p760_p12, %p759_p11 }
 0x2df   : > { %p762_p0 = pnand %p761_p13, %p755_p8 }
 0x2e1   : > { %765 = shalt.err (!%p762_p0)
}
 0x2e2   : > { %690 = dma.vmem_to_hbm [thread:$0]  (%p888_p5), %s952_s22, 128, %s950_s8, %s566_s9  }
 0x2e3 PF: > { %p696_p1 = scmp.ge.s32.totalorder %s800_s27, 2  ;;  %s591_s23 = sand.u32 1, %s788_s24  }
 0x2e4   : > { %s592_s29 = scalar_lea.sflag [#allocation5], %s591_s23 }
 0x2e5   : > { %p693_p2 = pnand %p696_p1, %p892_p6 }
 0x2e7   : > { %783 = dma.done.wait (!%p693_p2), %s592_s29, 128  }
 0x2e8   : > { %785 = vsyncadd (!%p693_p2), %s592_s29, 4294967168  ;;  %p17_p3 = scmp.ge.s32.totalorder %s875_s30, 4   ;;  %s1003_s24 = smov %s792_s25 }
 0x2e9   : > { %s1004_s25 = smov %s796_s26  ;;  %s1005_s26 = smov %s886_s10 }
 0x2ea   : > { %s1006_s27 = smov %s875_s30  ;;  %19 = sbr.rel (!%p17_p3) target bundleno = 3 (0x3), region = 83 }
 0x2f1   :  { %597 = vsyncpa [#allocation5], 1 }
 0x2f2   :  { %599 = vsyncpa [#allocation5 + $0x1], 1 }

</bundles_post_ra>
